<compile_context>
chip_gen: v7x
topology: tpu7x:2x2x1
jax: 0.10.0
libtpu: 0.0.40
codegen_flags: <defaults>
</compile_context>

<pallas_src>
import math

import jax
import jax.numpy as jnp
from jax.experimental import pallas as pl
from jax.experimental.pallas import tpu as pltpu

_LANES = 1024                          # lane-dense slab width for the flat path
_MAX_COL_BLOCK = 8192                  # cap on column block width (multiple of 128)
_TARGET_BLOCK_BYTES = 4 * 1024 * 1024  # ~4 MiB blocks (x4 double-buffered in+out = 16 MiB)
_SINGLE_BLOCK_BYTES = 4 * 1024 * 1024  # small/ragged tensors run as one full-extent block
_VMEM_LIMIT_BYTES = 48 * 1024 * 1024   # under v7x's 64 MiB physical VMEM per TC
_SUBLANE_BY_ITEMSIZE = {4: 8, 2: 16, 1: 32}


def _cos2prob_kernel(x_ref, o_ref):
    # Pure VPU elementwise map; (x + 1) * 0.5 == (x + 1) / 2 exactly in binary FP.
    o_ref[...] = (x_ref[...] + 1.0) * 0.5


def _ceil_to(x: int, m: int) -> int:
    return -(-x // m) * m


def _pick_blocks(rows: int, cols: int, itemsize: int, sublane: int):
    """Pick (row_block, col_block) for a lane-dense (rows, cols) slab."""
    cpb = cols if cols <= _MAX_COL_BLOCK else _MAX_COL_BLOCK
    row_bytes = max(1, cpb * itemsize)
    target_rows = max(sublane, (_TARGET_BLOCK_BYTES // row_bytes) // sublane * sublane)

    if rows <= target_rows:
        # Whole row extent fits one block; still split in two so both of v7x's
        # TensorCores stream HBM (no-op on single-core v5e/v6e).
        if rows >= 2 * sublane:
            rpb = min(rows, _ceil_to(-(-rows // 2), sublane))
        else:
            rpb = rows
        return rpb, cpb

    n_blocks = -(-rows // target_rows)
    if 1 < n_blocks < 8 and n_blocks % 2 == 1:
        n_blocks += 1  # keep the two TensorCores balanced on v7x
    rpb = min(rows, max(sublane, _ceil_to(-(-rows // n_blocks), sublane)))
    return rpb, cpb


def _launch(x2d: jax.Array, rpb: int, cpb: int, donate: bool) -> jax.Array:
    rows, cols = x2d.shape
    grid = (pl.cdiv(rows, rpb), pl.cdiv(cols, cpb))
    kwargs = {}
    if donate:
        kwargs["input_output_aliases"] = {0: 0}
    return pl.pallas_call(
        _cos2prob_kernel,
        out_shape=jax.ShapeDtypeStruct((rows, cols), x2d.dtype),
        grid_spec=pltpu.PrefetchScalarGridSpec(
            num_scalar_prefetch=0,
            grid=grid,
            in_specs=[pl.BlockSpec((rpb, cpb), lambda i, j: (i, j))],
            out_specs=pl.BlockSpec((rpb, cpb), lambda i, j: (i, j)),
        ),
        compiler_params=pltpu.CompilerParams(
            dimension_semantics=("parallel", "parallel"),
            vmem_limit_bytes=_VMEM_LIMIT_BYTES,
        ),
        **kwargs,
    )(x2d)


def cosine_similarity_to_probability(cos_sim: jax.Array, *, donate_input: bool = False) -> jax.Array:
    """(cos_sim + 1) / 2, computed in a Pallas TPU kernel (any rank/shape)."""
    shape = cos_sim.shape
    dtype = cos_sim.dtype
    n = int(math.prod(shape)) if shape else 1

    # Degenerate / non-float inputs: plain XLA keeps torch's promotion semantics.
    if n == 0 or not jnp.issubdtype(dtype, jnp.floating):
        return (cos_sim + 1) / 2

    itemsize = jnp.dtype(dtype).itemsize
    sublane = _SUBLANE_BY_ITEMSIZE.get(itemsize, 8)

    # Collapsed 2-D view (contiguous reshape == free bitcast).
    if len(shape) >= 2:
        rows2d, cols2d = int(math.prod(shape[:-1])), int(shape[-1])
    else:
        rows2d, cols2d = 1, n

    chunk = sublane * _LANES
    if n % chunk == 0:
        # Flat lane-dense path: full-width unmasked vector stores.
        x2d = cos_sim.reshape(n // _LANES, _LANES)
        rpb, cpb = _pick_blocks(*x2d.shape, itemsize, sublane)
        out2d = _launch(x2d, rpb, cpb, donate_input)
    elif cols2d % 128 == 0 and rows2d % sublane == 0:
        # Native 2-D view is already lane-dense: zero-copy, tiled over rows (and cols).
        x2d = cos_sim.reshape(rows2d, cols2d)
        rpb, cpb = _pick_blocks(rows2d, cols2d, itemsize, sublane)
        out2d = _launch(x2d, rpb, cpb, donate_input)
    elif n * itemsize <= _SINGLE_BLOCK_BYTES:
        # Small / ragged: one full-extent block (block_shape == array dims), no pad/slice.
        x2d = cos_sim.reshape(rows2d, cols2d)
        out2d = _launch(x2d, rows2d, cols2d, donate_input)
    else:
        # TODO(synk): large ragged tensors fall back to XLA (equally HBM-bound); an
        # in-kernel masked-tail Pallas path could replace this if such shapes matter.
        return (cos_sim + 1) / 2

    return out2d.reshape(shape)


if __name__ == "__main__":
    key = jax.random.PRNGKey(0)
    k0, k1, k2, k3 = jax.random.split(key, 4)

    # Small NCHW-like cosine-similarity tensor -> single full-extent block path.
    x = jax.random.uniform(k0, (2, 4, 16, 16), dtype=jnp.float32, minval=-1.0, maxval=1.0)
    y = jax.block_until_ready(cosine_similarity_to_probability(x))
    assert y.shape == x.shape and y.dtype == x.dtype
    assert jnp.allclose(y, (x + 1.0) / 2.0, atol=1e-6), "mismatch (single-block path)"

    # Aligned tensor -> flat lane-dense path, tiled, >=2 parallel blocks (v7x megacore).
    x2 = jax.random.uniform(k1, (64, 4096), dtype=jnp.float32, minval=-1.0, maxval=1.0)
    y2 = jax.block_until_ready(cosine_similarity_to_probability(x2))
    assert jnp.allclose(y2, (x2 + 1.0) / 2.0, atol=1e-6), "mismatch (lane-dense path)"

    # Odd, non-aligned shape -> zero-copy single-block path (no pad / slice glue).
    x3 = jax.random.uniform(k2, (3, 5, 7), dtype=jnp.float32, minval=-1.0, maxval=1.0)
    y3 = jax.block_until_ready(cosine_similarity_to_probability(x3))
    assert y3.shape == x3.shape
    assert jnp.allclose(y3, (x3 + 1.0) / 2.0, atol=1e-6), "mismatch (ragged path)"

    # bf16 -> dtype-aware (16, 128) sublane granularity.
    x4 = jax.random.uniform(k3, (32, 256), minval=-1.0, maxval=1.0).astype(jnp.bfloat16)
    y4 = jax.block_until_ready(cosine_similarity_to_probability(x4))
    assert y4.dtype == jnp.bfloat16 and y4.shape == x4.shape
    assert jnp.allclose(y4.astype(jnp.float32), ((x4 + 1.0) * 0.5).astype(jnp.float32),
                        atol=2e-2), "mismatch (bf16 path)"

    print("KERNEL_OK")
</pallas_src>

<mosaic_0001>
module attributes {stable_mosaic.version = 11 : i64} {
  func.func @_cos2prob_kernel(%arg0: i32, %arg1: i32, %arg2: memref<128x16xf32, #tpu.memory_space<vmem>>, %arg3: memref<128x16xf32, #tpu.memory_space<vmem>>) attributes {dimension_semantics = [#tpu.dimension_semantics<parallel>, #tpu.dimension_semantics<parallel>], iteration_bounds = array<i64: 1, 1>, scalar_prefetch = 0 : i64, scratch_operands = 0 : i64, tpu.core_type = #tpu.core_type<tc>, window_params = [{transform_indices = @transform_0, window_bounds = array<i64: 128, 16>}, {transform_indices = @transform_1, window_bounds = array<i64: 128, 16>}]} {
    %c0 = arith.constant 0 : index
    %c0_0 = arith.constant 0 : index
    %0 = vector.load %arg2[%c0, %c0_0] : memref<128x16xf32, #tpu.memory_space<vmem>>, vector<128x16xf32>
    %cst = arith.constant 1.000000e+00 : f32
    %1 = vector.broadcast %cst : f32 to vector<128x16xf32>
    %2 = arith.addf %0, %1 : vector<128x16xf32>
    %cst_1 = arith.constant 5.000000e-01 : f32
    %3 = vector.broadcast %cst_1 : f32 to vector<128x16xf32>
    %4 = arith.mulf %2, %3 : vector<128x16xf32>
    %c0_2 = arith.constant 0 : index
    %c0_3 = arith.constant 0 : index
    %5 = vector.load %arg3[%c0_2, %c0_3] : memref<128x16xf32, #tpu.memory_space<vmem>>, vector<128x16xf32>
    tpu.vector_store %arg3[%c0_2, %c0_3], %4 {strides = array<i32>} : memref<128x16xf32, #tpu.memory_space<vmem>>, vector<128x16xf32>,
    return
  }
  func.func @transform_0(%arg0: i32, %arg1: i32) -> (i32, i32) {
    %c0_i32 = arith.constant 0 : i32
    return %arg0, %arg1 : i32, i32
  }
  func.func @transform_1(%arg0: i32, %arg1: i32) -> (i32, i32) {
    %c0_i32 = arith.constant 0 : i32
    return %arg0, %arg1 : i32, i32
  }
}

</mosaic_0001>

<bundles_post_ra>
// kernel: tpu_custom_call.1
= control target key start
LH: loop header
LB: loop body
LE: loop exit
PB: predicated region body
PF: predicated region fallthrough
CT: control target
= control target key end

     0   :  { %vm56_vm0 = vcmask 130048   ;;  %s199_s0 = inlined_call_operand.vmem [shape: f32[128,16], index: 0, kind: input, shape index: {}]   ;;  %s200_s1 = inlined_call_operand.vmem [shape: f32[128,16], index: 1, kind: output, shape index: {}]  }
   0x1   :  { %v8_v0 = vld [vmem:[%s199_s0] sm:$0xff]  ;;  %v9_v1 = vld [vmem:[%s199_s0 + $0x8] sm:$0xff]  ;;  %v10_v2 = vld [vmem:[%s199_s0 + $0x10] sm:$0xff] }
   0x2   :  { %v24_v3 = vadd.f32 1.0, %v8_v0  ;;  %v25_v4 = vadd.f32 1.0, %v9_v1  ;;  %v26_v5 = vadd.f32 1.0, %v10_v2  ;;  %v11_v6 = vld [vmem:[%s199_s0 + $0x18] sm:$0xff]  ;;  %v12_v7 = vld [vmem:[%s199_s0 + $0x20] sm:$0xff]  ;;  %v13_v8 = vld [vmem:[%s199_s0 + $0x28] sm:$0xff] }
   0x3   :  { %v27_v9 = vadd.f32 1.0, %v11_v6  ;;  %v28_v10 = vadd.f32 1.0, %v12_v7  ;;  %v29_v11 = vadd.f32 1.0, %v13_v8  ;;  %v14_v12 = vld [vmem:[%s199_s0 + $0x30] sm:$0xff]  ;;  %v15_v13 = vld [vmem:[%s199_s0 + $0x38] sm:$0xff]  ;;  %v16_v14 = vld [vmem:[%s199_s0 + $0x40] sm:$0xff] }
   0x4   :  { %v40_v15 = vmul.f32 0.5, %v24_v3  ;;  %v41_v16 = vmul.f32 0.5, %v25_v4  ;;  %v42_v17 = vmul.f32 0.5, %v26_v5  ;;  %v30_v18 = vadd.f32 1.0, %v14_v12  ;;  %v17_v19 = vld [vmem:[%s199_s0 + $0x48] sm:$0xff]  ;;  %v18_v20 = vld [vmem:[%s199_s0 + $0x50] sm:$0xff] }
   0x5   :  { %v43_v21 = vmul.f32 0.5, %v27_v9  ;;  %v44_v22 = vmul.f32 0.5, %v28_v10  ;;  %v45_v23 = vmul.f32 0.5, %v29_v11  ;;  %v31_v24 = vadd.f32 1.0, %v15_v13  ;;  %v19_v25 = vld [vmem:[%s199_s0 + $0x58] sm:$0xff]  ;;  %v20_v26 = vld [vmem:[%s199_s0 + $0x60] sm:$0xff] }
   0x6   :  { %57 = vst.msk [vmem:[%s200_s1] sm:$0xff] %vm56_vm0, %v40_v15  ;;  %58 = vst.msk [vmem:[%s200_s1 + $0x8] sm:$0xff] %vm56_vm0, %v41_v16  ;;  %v46_v27 = vmul.f32 0.5, %v30_v18  ;;  %v32_v28 = vadd.f32 1.0, %v16_v14  ;;  %v33_v29 = vadd.f32 1.0, %v17_v19  ;;  %v34_v30 = vadd.f32 1.0, %v18_v20 }
   0x7   :  { %59 = vst.msk [vmem:[%s200_s1 + $0x10] sm:$0xff] %vm56_vm0, %v42_v17  ;;  %v21_v31 = vld [vmem:[%s199_s0 + $0x68] sm:$0xff]  ;;  %v22_v32 = vld [vmem:[%s199_s0 + $0x70] sm:$0xff]  ;;  %60 = vst.msk [vmem:[%s200_s1 + $0x18] sm:$0xff] %vm56_vm0, %v43_v21  ;;  %v47_v33 = vmul.f32 0.5, %v31_v24  ;;  %v35_v34 = vadd.f32 1.0, %v19_v25 }
   0x8   :  { %61 = vst.msk [vmem:[%s200_s1 + $0x20] sm:$0xff] %vm56_vm0, %v44_v22  ;;  %62 = vst.msk [vmem:[%s200_s1 + $0x28] sm:$0xff] %vm56_vm0, %v45_v23  ;;  %v36_v35 = vadd.f32 1.0, %v20_v26  ;;  %v37_v36 = vadd.f32 1.0, %v21_v31  ;;  %v23_v37 = vld [vmem:[%s199_s0 + $0x78] sm:$0xff]  ;;  %v48_v38 = vmul.f32 0.5, %v32_v28 }
   0x9   :  { %63 = vst.msk [vmem:[%s200_s1 + $0x30] sm:$0xff] %vm56_vm0, %v46_v27  ;;  %v49_v39 = vmul.f32 0.5, %v33_v29  ;;  %v50_v40 = vmul.f32 0.5, %v34_v30  ;;  %v38_v41 = vadd.f32 1.0, %v22_v32  ;;  %64 = vst.msk [vmem:[%s200_s1 + $0x38] sm:$0xff] %vm56_vm0, %v47_v33  ;;  %v51_v42 = vmul.f32 0.5, %v35_v34 }
   0xa   :  { %v52_v43 = vmul.f32 0.5, %v36_v35  ;;  %v53_v44 = vmul.f32 0.5, %v37_v36  ;;  %v39_v45 = vadd.f32 1.0, %v23_v37  ;;  %65 = vst.msk [vmem:[%s200_s1 + $0x40] sm:$0xff] %vm56_vm0, %v48_v38 }
   0xb   :  { %66 = vst.msk [vmem:[%s200_s1 + $0x48] sm:$0xff] %vm56_vm0, %v49_v39  ;;  %67 = vst.msk [vmem:[%s200_s1 + $0x50] sm:$0xff] %vm56_vm0, %v50_v40  ;;  %v54_v46 = vmul.f32 0.5, %v38_v41 }
   0xc   :  { %68 = vst.msk [vmem:[%s200_s1 + $0x58] sm:$0xff] %vm56_vm0, %v51_v42  ;;  %69 = vst.msk [vmem:[%s200_s1 + $0x60] sm:$0xff] %vm56_vm0, %v52_v43  ;;  %v55_v47 = vmul.f32 0.5, %v39_v45 }
   0xd   :  { %70 = vst.msk [vmem:[%s200_s1 + $0x68] sm:$0xff] %vm56_vm0, %v53_v44  ;;  %71 = vst.msk [vmem:[%s200_s1 + $0x70] sm:$0xff] %vm56_vm0, %v54_v46 }
   0xe   :  { %72 = vst.msk [vmem:[%s200_s1 + $0x78] sm:$0xff] %vm56_vm0, %v55_v47 }

</bundles_post_ra>
